<compile_context>
chip_gen: v5e
topology: v5e:2x2
jax: 0.10.0
libtpu: 0.0.40
codegen_flags: <defaults>
</compile_context>

<pallas_src>
import jax
import jax.numpy as jnp
from jax.experimental import pallas as pl
from jax.experimental.pallas import tpu as pltpu

BN_EPS = 1e-5


# ----------------------------------------------------------------------------
# Tiling plan (per TPU generation)
# ----------------------------------------------------------------------------
def _round_up(x, m):
    return ((x + m - 1) // m) * m


def _vmem_capacity_bytes():
    try:
        return int(pltpu.get_tpu_info().vmem_capacity_bytes)
    except Exception:
        return 64 << 20  # most conservative per-core VMEM (v7x)


def _plan(N, Cin, Cout, spatial, w_itemsize, max_lanes_per_tile=None):
    """Pick (batch block, spatial tile, vmem_limit) sized for this chip's VMEM."""
    cap = _vmem_capacity_bytes()
    # ~65% of physical VMEM: ~42 MiB on v7x (64 MiB), ~83 MiB on v5e/v6e (128 MiB).
    target = int(cap * 0.65)

    cin_p = _round_up(Cin, 8)
    cout_p = _round_up(Cout, 8)

    # Resident (grid-invariant) blocks: folded weight + shift.  Accounted as
    # double-buffered even though we request Buffered(1), to keep headroom if the
    # single-buffer request is ignored.  Plus compiler-internal scratch margin.
    fixed = 2 * (cout_p * _round_up(Cin, 128) * w_itemsize + cout_p * 128 * 4)
    fixed += 2 << 20
    budget = max(target - fixed, 4 << 20)

    # Fold the batch into one block for tiny FPN levels (spatial < 128 lanes).
    nb = N if spatial < 128 else 1

    # Double-buffered f32 x tile + f32 out tile, per lane column.
    bytes_per_lane = 2 * nb * (cin_p + cout_p) * 4
    cap_lanes = max(128, (budget // bytes_per_lane) // 128 * 128)
    if max_lanes_per_tile is not None:
        cap_lanes = max(128, min(cap_lanes, _round_up(max_lanes_per_tile, 128)))

    if spatial <= cap_lanes:
        ts = spatial  # full dim is always layout-legal (even if < 128)
    else:
        # Balance tiles so the last one is not a nearly-empty remainder.
        n_tiles = pl.cdiv(spatial, cap_lanes)
        ts = _round_up(pl.cdiv(spatial, n_tiles), 128)

    return nb, ts, target


# ----------------------------------------------------------------------------
# Kernel: one (batch-block, spatial-tile) grid point
# ----------------------------------------------------------------------------
def _lateral_kernel(x_ref, w_ref, shift_ref, o_ref):
    # x_ref:     (nb, Cin, ts)   channels on sublanes, spatial on lanes
    # w_ref:     (Cout, Cin)     BN scale already folded in (f32 or bf16)
    # shift_ref: (Cout, 1)       per-output-channel shift (f32, lane-broadcast)
    # o_ref:     (nb, Cout, ts)  lane-dense output tile
    w = w_ref[...]
    shift = shift_ref[...]
    for n in range(x_ref.shape[0]):  # static loop; nb is 1 (usual) or N (tiny levels)
        acc = jnp.dot(w, x_ref[n].astype(w.dtype),
                      preferred_element_type=jnp.float32)
        o_ref[n] = jnp.maximum(acc + shift, 0.0).astype(o_ref.dtype)


def _pallas_forward(x3, w_folded, shift, nb, ts, vmem_limit, single_buffer_consts):
    N, Cin, spatial = x3.shape
    Cout = w_folded.shape[0]
    const_kw = {"pipeline_mode": pl.Buffered(1)} if single_buffer_consts else {}
    grid = (N // nb, pl.cdiv(spatial, ts))

    cost = pl.CostEstimate(
        flops=int(2 * N * Cout * Cin * spatial),
        transcendentals=0,
        bytes_accessed=int(4 * N * spatial * (Cin + Cout)
                           + Cout * Cin * jnp.dtype(w_folded.dtype).itemsize
                           + 4 * Cout),
    )

    return pl.pallas_call(
        _lateral_kernel,
        out_shape=jax.ShapeDtypeStruct((N, Cout, spatial), jnp.float32),
        grid=grid,
        in_specs=[
            pl.BlockSpec((nb, Cin, ts), lambda b, s: (b, 0, s)),           # x tile
            pl.BlockSpec((Cout, Cin), lambda b, s: (0, 0), **const_kw),    # weight
            pl.BlockSpec((Cout, 1), lambda b, s: (0, 0), **const_kw),      # shift
        ],
        out_specs=pl.BlockSpec((nb, Cout, ts), lambda b, s: (b, 0, s)),
        compiler_params=pltpu.CompilerParams(
            dimension_semantics=("parallel", "parallel"),
            vmem_limit_bytes=int(vmem_limit),
        ),
        cost_estimate=cost,
    )(x3, w_folded, shift)


# ----------------------------------------------------------------------------
# Wrapper: BasicLateralBlock.forward (eval mode)
# ----------------------------------------------------------------------------
def basic_lateral_block_forward(x_nchw, w, b, gamma, beta, mean, var,
                                matmul_dtype=None, max_lanes_per_tile=None):
    """1x1 Conv2d(bias) + BatchNorm2d(eval, running stats) + ReLU.

    x_nchw: (N, Cin, H, W) float32 ; w: (Cout, Cin) 1x1 conv kernel (squeezed)
    returns (N, Cout, H, W) float32
    """
    N, Cin, H, W = x_nchw.shape
    Cout = w.shape[0]
    spatial = H * W

    if matmul_dtype is None:
        # bf16 MXU path at realistic FPN channel counts; f32 for tiny Cin where
        # precision matters more than MXU throughput / bandwidth.
        matmul_dtype = jnp.bfloat16 if Cin >= 256 else jnp.float32

    # Fold eval-mode BN into conv weight + per-channel shift (wrapper-side, once).
    scale = gamma.astype(jnp.float32) / jnp.sqrt(var.astype(jnp.float32) + BN_EPS)
    w_folded = (w.astype(jnp.float32) * scale[:, None]).astype(matmul_dtype)
    shift = (((b.astype(jnp.float32) - mean.astype(jnp.float32)) * scale)
             + beta.astype(jnp.float32))[:, None]               # (Cout, 1) f32

    x3 = x_nchw.reshape(N, Cin, spatial)  # contiguous NCHW -> free reshape
    nb, ts, vmem_limit = _plan(N, Cin, Cout, spatial,
                               jnp.dtype(matmul_dtype).itemsize,
                               max_lanes_per_tile)

    try:
        out3 = _pallas_forward(x3, w_folded, shift, nb, ts, vmem_limit, True)
        jax.block_until_ready(out3)
    except Exception:
        # pipeline_mode=pl.Buffered(1) not supported on this jax build -> default
        # double buffering (same semantics, slightly more VMEM).
        out3 = _pallas_forward(x3, w_folded, shift, nb, ts, vmem_limit, False)
    return out3.reshape(N, Cout, H, W)


# TODO(synk): training-mode BatchNorm2d (batch statistics + running-stat update)
#             is not implemented; only eval-mode BN (folded) is supported.


# ----------------------------------------------------------------------------
# Pure-JAX reference (mirrors the PyTorch eval-mode forward)
# ----------------------------------------------------------------------------
def basic_lateral_block_reference(x, w, b, gamma, beta, mean, var):
    y = jnp.einsum('nchw,oc->nohw', x, w, precision=jax.lax.Precision.HIGHEST)
    y = y + b[None, :, None, None]
    y = (y - mean[None, :, None, None]) / jnp.sqrt(var[None, :, None, None] + BN_EPS)
    y = y * gamma[None, :, None, None] + beta[None, :, None, None]
    return jnp.maximum(y, 0.0)


def _make_params(key, cin, cout):
    kw, kb, kg, kbe, km, kv = jax.random.split(key, 6)
    return dict(
        w=0.1 * jax.random.normal(kw, (cout, cin), jnp.float32),
        b=0.1 * jax.random.normal(kb, (cout,), jnp.float32),
        gamma=1.0 + 0.1 * jax.random.normal(kg, (cout,), jnp.float32),
        beta=0.1 * jax.random.normal(kbe, (cout,), jnp.float32),
        mean=0.1 * jax.random.normal(km, (cout,), jnp.float32),
        var=jax.nn.softplus(jax.random.normal(kv, (cout,), jnp.float32)) + 0.5,
    )


if __name__ == "__main__":
    key = jax.random.PRNGKey(0)
    k_x1, k_p1, k_x2, k_p2, k_x3, k_p3 = jax.random.split(key, 6)

    # Case 1: typical small FPN lateral input; spatial >= 128 -> per-batch grid, f32 MXU.
    x1 = jax.random.normal(k_x1, (2, 4, 16, 16), jnp.float32)   # (N, Cin, H, W)
    p1 = _make_params(k_p1, cin=4, cout=8)
    y1 = basic_lateral_block_forward(x1, **p1)
    jax.block_until_ready(y1)
    r1 = basic_lateral_block_reference(x1, **p1)
    assert y1.shape == (2, 8, 16, 16)
    assert jnp.allclose(y1, r1, atol=1e-4, rtol=1e-4)

    # Case 2: spatial < 128 -> batch folded into a single block / grid step.
    x2 = jax.random.normal(k_x2, (2, 16, 8, 8), jnp.float32)
    p2 = _make_params(k_p2, cin=16, cout=8)
    y2 = basic_lateral_block_forward(x2, **p2)
    jax.block_until_ready(y2)
    r2 = basic_lateral_block_reference(x2, **p2)
    assert y2.shape == (2, 8, 8, 8)
    assert jnp.allclose(y2, r2, atol=1e-4, rtol=1e-4)

    # Case 3: larger channel count -> bf16 MXU path; forced small lane cap to also
    # exercise balanced multi-tile spatial grid with a ragged last tile.
    x3 = jax.random.normal(k_x3, (1, 256, 20, 20), jnp.float32)
    p3 = _make_params(k_p3, cin=256, cout=64)
    y3 = basic_lateral_block_forward(x3, max_lanes_per_tile=256, **p3)
    jax.block_until_ready(y3)
    r3 = basic_lateral_block_reference(x3, **p3)
    assert y3.shape == (1, 64, 20, 20)
    assert jnp.allclose(y3, r3, atol=1e-1, rtol=2e-2)   # bf16 matmul tolerance

    print("KERNEL_OK")
</pallas_src>

<mosaic_0001>
module attributes {stable_mosaic.version = 11 : i64} {
  func.func @_lateral_kernel(%arg0: i32, %arg1: i32, %arg2: memref<1x4x256xf32, #tpu.memory_space<vmem>>, %arg3: memref<8x4xf32, #tpu.memory_space<vmem>>, %arg4: memref<8x1xf32, #tpu.memory_space<vmem>>, %arg5: memref<1x8x256xf32, #tpu.memory_space<vmem>>) attributes {dimension_semantics = [#tpu.dimension_semantics<parallel>, #tpu.dimension_semantics<parallel>], iteration_bounds = array<i64: 2, 1>, scalar_prefetch = 0 : i64, scratch_operands = 0 : i64, tpu.core_type = #tpu.core_type<tc>, window_params = [{transform_indices = @transform_0, window_bounds = array<i64: 1, 4, 256>}, {pipeline_mode = #tpu.pipeline_mode<synchronous>, transform_indices = @transform_1, window_bounds = array<i64: 8, 4>}, {pipeline_mode = #tpu.pipeline_mode<synchronous>, transform_indices = @transform_2, window_bounds = array<i64: 8, 1>}, {transform_indices = @transform_3, window_bounds = array<i64: 1, 8, 256>}]} {
    %c0 = arith.constant 0 : index
    %c0_0 = arith.constant 0 : index
    %0 = vector.load %arg3[%c0, %c0_0] : memref<8x4xf32, #tpu.memory_space<vmem>>, vector<8x4xf32>
    %c0_1 = arith.constant 0 : index
    %c0_2 = arith.constant 0 : index
    %1 = vector.load %arg4[%c0_1, %c0_2] : memref<8x1xf32, #tpu.memory_space<vmem>>, vector<8x1xf32>
    %c0_3 = arith.constant 0 : index
    %c0_4 = arith.constant 0 : index
    %c0_5 = arith.constant 0 : index
    %2 = vector.load %arg2[%c0_3, %c0_4, %c0_5] : memref<1x4x256xf32, #tpu.memory_space<vmem>>, vector<1x4x256xf32>
    %3 = vector.shape_cast %2 : vector<1x4x256xf32> to vector<4x256xf32>
    %cst = arith.constant dense<0.000000e+00> : vector<8x256xf32>
    %4 = tpu.matmul %0, %3, %cst {dimension_numbers = #tpu.dot_dimension_numbers<[1], [0], [0], [1], [0, 0, 1, 1], [], []>} : vector<8x4xf32>, vector<4x256xf32>, vector<8x256xf32> -> vector<8x256xf32>
    %5 = vector.broadcast %1 : vector<8x1xf32> to vector<8x256xf32>
    %6 = arith.addf %4, %5 : vector<8x256xf32>
    %cst_6 = arith.constant 0.000000e+00 : f32
    %7 = vector.broadcast %cst_6 : f32 to vector<8x256xf32>
    %8 = arith.maximumf %6, %7 : vector<8x256xf32>
    %c0_7 = arith.constant 0 : index
    %c0_8 = arith.constant 0 : index
    %c0_9 = arith.constant 0 : index
    %9 = vector.load %arg5[%c0_7, %c0_8, %c0_9] : memref<1x8x256xf32, #tpu.memory_space<vmem>>, vector<1x8x256xf32>
    %10 = vector.shape_cast %9 : vector<1x8x256xf32> to vector<8x256xf32>
    %11 = vector.shape_cast %8 : vector<8x256xf32> to vector<1x8x256xf32>
    tpu.vector_store %arg5[%c0_7, %c0_8, %c0_9], %11 {strides = array<i32>} : memref<1x8x256xf32, #tpu.memory_space<vmem>>, vector<1x8x256xf32>,
    return
  }
  func.func @transform_0(%arg0: i32, %arg1: i32) -> (i32, i32, i32) {
    %c0_i32 = arith.constant 0 : i32
    %c0_i32_0 = arith.constant 0 : i32
    return %arg0, %c0_i32, %arg1 : i32, i32, i32
  }
  func.func @transform_1(%arg0: i32, %arg1: i32) -> (i32, i32) {
    %c0_i32 = arith.constant 0 : i32
    %c0_i32_0 = arith.constant 0 : i32
    %c0_i32_1 = arith.constant 0 : i32
    return %c0_i32, %c0_i32_0 : i32, i32
  }
  func.func @transform_2(%arg0: i32, %arg1: i32) -> (i32, i32) {
    %c0_i32 = arith.constant 0 : i32
    %c0_i32_0 = arith.constant 0 : i32
    %c0_i32_1 = arith.constant 0 : i32
    return %c0_i32, %c0_i32_0 : i32, i32
  }
  func.func @transform_3(%arg0: i32, %arg1: i32) -> (i32, i32, i32) {
    %c0_i32 = arith.constant 0 : i32
    %c0_i32_0 = arith.constant 0 : i32
    return %arg0, %c0_i32, %arg1 : i32, i32, i32
  }
}

module attributes {stable_mosaic.version = 11 : i64} {
  func.func @_lateral_kernel(%arg0: i32, %arg1: i32, %arg2: memref<1x4x256xf32, #tpu.memory_space<vmem>>, %arg3: memref<8x4xf32, #tpu.memory_space<vmem>>, %arg4: memref<8x1xf32, #tpu.memory_space<vmem>>, %arg5: memref<1x8x256xf32, #tpu.memory_space<vmem>>) attributes {dimension_semantics = [#tpu.dimension_semantics<parallel>, #tpu.dimension_semantics<parallel>], iteration_bounds = array<i64: 2, 1>, scalar_prefetch = 0 : i64, scratch_operands = 0 : i64, tpu.core_type = #tpu.core_type<tc>, window_params = [{transform_indices = @transform_0, window_bounds = array<i64: 1, 4, 256>}, {pipeline_mode = #tpu.pipeline_mode<synchronous>, transform_indices = @transform_1, window_bounds = array<i64: 8, 4>}, {pipeline_mode = #tpu.pipeline_mode<synchronous>, transform_indices = @transform_2, window_bounds = array<i64: 8, 1>}, {transform_indices = @transform_3, window_bounds = array<i64: 1, 8, 256>}]} {
    %c0 = arith.constant 0 : index
    %c0_0 = arith.constant 0 : index
    %0 = vector.load %arg3[%c0, %c0_0] : memref<8x4xf32, #tpu.memory_space<vmem>>, vector<8x4xf32>
    %c0_1 = arith.constant 0 : index
    %c0_2 = arith.constant 0 : index
    %1 = vector.load %arg4[%c0_1, %c0_2] : memref<8x1xf32, #tpu.memory_space<vmem>>, vector<8x1xf32>
    %c0_3 = arith.constant 0 : index
    %c0_4 = arith.constant 0 : index
    %c0_5 = arith.constant 0 : index
    %2 = vector.load %arg2[%c0_3, %c0_4, %c0_5] : memref<1x4x256xf32, #tpu.memory_space<vmem>>, vector<1x4x256xf32>
    %3 = vector.shape_cast %2 : vector<1x4x256xf32> to vector<4x256xf32>
    %cst = arith.constant dense<0.000000e+00> : vector<8x256xf32>
    %4 = tpu.matmul %0, %3, %cst {dimension_numbers = #tpu.dot_dimension_numbers<[1], [0], [0], [1], [0, 0, 1, 1], [], []>} : vector<8x4xf32>, vector<4x256xf32>, vector<8x256xf32> -> vector<8x256xf32>
    %5 = vector.broadcast %1 : vector<8x1xf32> to vector<8x256xf32>
    %6 = arith.addf %4, %5 : vector<8x256xf32>
    %cst_6 = arith.constant 0.000000e+00 : f32
    %7 = vector.broadcast %cst_6 : f32 to vector<8x256xf32>
    %8 = arith.maximumf %6, %7 : vector<8x256xf32>
    %c0_7 = arith.constant 0 : index
    %c0_8 = arith.constant 0 : index
    %c0_9 = arith.constant 0 : index
    %9 = vector.load %arg5[%c0_7, %c0_8, %c0_9] : memref<1x8x256xf32, #tpu.memory_space<vmem>>, vector<1x8x256xf32>
    %10 = vector.shape_cast %9 : vector<1x8x256xf32> to vector<8x256xf32>
    %11 = vector.shape_cast %8 : vector<8x256xf32> to vector<1x8x256xf32>
    tpu.vector_store %arg5[%c0_7, %c0_8, %c0_9], %11 {strides = array<i32>} : memref<1x8x256xf32, #tpu.memory_space<vmem>>, vector<1x8x256xf32>,
    return
  }
  func.func @transform_0(%arg0: i32, %arg1: i32) -> (i32, i32, i32) {
    %c0_i32 = arith.constant 0 : i32
    %c0_i32_0 = arith.constant 0 : i32
    return %arg0, %c0_i32, %arg1 : i32, i32, i32
  }
  func.func @transform_1(%arg0: i32, %arg1: i32) -> (i32, i32) {
    %c0_i32 = arith.constant 0 : i32
    %c0_i32_0 = arith.constant 0 : i32
    %c0_i32_1 = arith.constant 0 : i32
    return %c0_i32, %c0_i32_0 : i32, i32
  }
  func.func @transform_2(%arg0: i32, %arg1: i32) -> (i32, i32) {
    %c0_i32 = arith.constant 0 : i32
    %c0_i32_0 = arith.constant 0 : i32
    %c0_i32_1 = arith.constant 0 : i32
    return %c0_i32, %c0_i32_0 : i32, i32
  }
  func.func @transform_3(%arg0: i32, %arg1: i32) -> (i32, i32, i32) {
    %c0_i32 = arith.constant 0 : i32
    %c0_i32_0 = arith.constant 0 : i32
    return %arg0, %c0_i32, %arg1 : i32, i32, i32
  }
}

</mosaic_0001>

<bundles_post_ra>
// kernel: tpu_custom_call.1
= control target key start
LH: loop header
LB: loop body
LE: loop exit
PB: predicated region body
PF: predicated region fallthrough
CT: control target
= control target key end

     0   :  { %8 = vsyncpa [#allocation3], 0  ;;  %s640_s0 = inlined_call_operand.vmem [shape: f32[2,4,256], index: 0, kind: input, shape index: {}]   ;;  %s641_s1 = inlined_call_operand.vmem [shape: f32[8,4], index: 1, kind: input, shape index: {}]   ;;  %s642_s2 = inlined_call_operand.vmem [shape: f32[8,1], index: 2, kind: input, shape index: {}]   ;;  %s643_s3 = inlined_call_operand.hbm [shape: f32[2,8,256], index: 3, kind: output, shape index: {}]  }
   0x1   :  { %10 = vsyncpa [#allocation3 + $0x1], 0  ;;  %s537_s12 = smov 0   ;;  %s539_s13 = smov 0  }
   0x2   :  { %s541_s14 = smov 0   ;;  %s543_s15 = smov 0  }
   0x3   :  { %s545_s16 = smov 0   ;;  %s547_s17 = smov 0  }
   0x4 LB: > { %s360_s18 = sadd.s32 4294967295, %s514_s17   ;;  %s361_s19 = sadd.s32 4294967294, %s514_s17   ;;  %s514_s17 = sphi %s547_s17, %s16_s17   ;;  %s510_s16 = sphi %s545_s16, %s650_s16   ;;  %s506_s15 = sphi %s543_s15, %s649_s15   ;;  %s502_s14 = sphi %s541_s14, %s648_s14   ;;  %s498_s13 = sphi %s539_s13, %s647_s13   ;;  %s494_s12 = sphi %s537_s12, %s646_s12  }
   0x5   : > { %s28_s20 = sadd.s32 1, %s510_s16  ;;  %s107_s21 = sadd.s32 1, %s502_s14 }
   0x6   : > { %p30_p0 = scmp.ge.s32.totalorder %s28_s20, 2  ;;  %p117_p1 = scmp.ne.s32.totalorder %s502_s14, %s498_s13 }
   0x7   : > { %p118_p2 = scmp.eq.s32.totalorder %s360_s18, 1  ;;  %p123_p3 = scmp.ne.s32.totalorder %s498_s13, %s494_s12 }
   0x8   : > { %s652_s20 = smov (%p30_p0, %s28_s20), 0  ;;  %p124_p5 = scmp.eq.s32.totalorder %s361_s19, 1 }
   0x9   : > { %p577_p4 = por %p118_p2, %p117_p1  ;;  %s102_s23 = ssub.s32 %s510_s16, %s652_s20 }
   0xa   : > { %p364_p6 = scmp.ge.s32.totalorder %s514_s17, 1  ;;  %p105_p7 = scmp.eq.s32.totalorder %s102_s23, 0 }
   0xb   : > { %p584_p8 = por %p124_p5, %p123_p3  ;;  %p161_p9 = scmp.lt.s32.totalorder %s514_s17, 3 }
   0xc   : > { %s590_s25 = scalar_select %p105_p7, %s502_s14, %s107_s21  }
   0xd   : > { %p162_p10 = pnand %p364_p6, %p161_p9 }
   0xe   : > { %p190_p11 = scmp.lt.s32.totalorder (!%p162_p10), %s506_s15, 1  ;;  %s186_s8 = sand.u32 (!%p162_p10), 1, %s498_s13  }
   0xf   : > { %165 = sbr.rel (%p162_p10) target bundleno = 168 (0xa8), region = 32  ;;  %s365_s9 = sshll.u32 (!%p162_p10), %s186_s8, 4 }
  0x10   : > { %s378_s10 = sshll.u32 (!%p162_p10), %s506_s15, 4  ;;  %s188_s21 = scalar_lea.vmem (!%p162_p10), [#allocation2], %s365_s9 }
  0x11   : > { %s279_s19 = scalar_lea.hbm (!%p162_p10), %s643_s3, %s378_s10  ;;  %s281_s23 = sshll.u32 (!%p162_p10), %s188_s21, 4  ;;  %s282_s23 = int_to_ptr.vmem [resolvable:$true] %s281_s23 }
  0x12   : > { %s283_s26 = sshll.u32 (!%p162_p10), %s279_s19, 4  ;;  %s456_s4 = scalar_lea.hbm (!%p162_p10), %s643_s3, 32  ;;  %s284_s26 = int_to_ptr.hbm [resolvable:$true] %s283_s26 }
  0x13   : > { %s450_s27 = sshra.s32 (!%p162_p10), %s284_s26, 4  ;;  %s451_s27 = int_to_ptr.hbm [resolvable:$true] %s450_s27 }
  0x14   : > { %v201_v0 = vld [vmem:[%s642_s2] sm:$0xff]  ;;  %v516_v1 = vmov 0   ;;  %s191_s28 = scalar_select %p190_p11, %s506_s15, 1  ;;  %vm216_vm0 = vcmask 1043456   ;;  %vm212_vm1 = vcmask 31744  }
  0x15   : > { %435 = vset.pattern.permute.xlu0 %v516_v1  ;;  %v200_v3 = vld [vmem:[%s641_s1] sm:$0xff]  ;;  %s266_s15 = scalar_lea.sflag [#allocation3], %s186_s8  ;;  %p457_p1 = scmp.lt.s32.totalorder %s451_s27, %s643_s3 }
  0x16   : > { %205 = vperm.xlu0 %435, %v201_v0   ;;  %s377_s29 = sshll.u32 %s191_s28, 3  ;;  %s452_s28 = scalar_lea.hbm %s451_s27, 16 }
  0x17   : > { %s197_s5 = scalar_lea.vmem %s640_s0, %s377_s29  ;;  %p453_p12 = scmp.ne.s32.totalorder %s451_s27, %s452_s28 }
  0x18   : > { %v202_v2 = vld [vmem:[%s197_s5] sm:$0xff]  ;;  %p458_p2 = scmp.lt.s32.totalorder %s456_s4, %s452_s28 }
  0x19   : > { %209 = vst [vmem:[#allocation1] ss:$2 sm:$0xff] %v202_v2  ;;  %p454_p13 = pnand %p453_p12, %p577_p4 }
  0x1a   : > { %p459_p3 = por %p458_p2, %p457_p1 }
  0x1b   : > { %p455_p0 = pneg %p454_p13 }
  0x1d   : > { %p460_p5 = pnand %p459_p3, %p455_p0 }
  0x20   : > { %v210_v4 = vld.sshfl [vmem:[#allocation1] sm:$0xff pattern:$0x75316420]  ;;  %v211_v5 = vld.sshfl [vmem:[#allocation1 + $0x8] sm:$0xff pattern:$0x75316420] }
  0x21   : > { %368 = vmatpush.msk.msra.mxu0 %vm216_vm0, %v210_v4  ;;  %370 = vmatpush.msk.msra.mxu1 %vm216_vm0, %v211_v5 }
  0x22   : > { %369 = vmatmul.msk.f32.vlgmr.msra.gmra.mxu0 %vm212_vm1, %v200_v3  ;;  %371 = vmatmul.msk.f32.vlgmr.msra.gmra.mxu1 %vm212_vm1, %v200_v3 }
  0x88   : > { %v206_v6 = vpop.permute.xlu0 %205 }
  0x9f   : > { %v238_v7 = vpop.f32.mrf.mxu0  ;;  %v258_v8 = vpop.f32.mrf.mxu1 }
  0xa0   : > { %v239_v9 = vadd.f32 %v238_v7, %v206_v6  ;;  %v259_v10 = vadd.f32 %v258_v8, %v206_v6 }
  0xa2   : > { %v261_v11 = vmax.f32 %v239_v9, 0.0  ;;  %v262_v12 = vmax.f32 %v259_v10, 0.0 }
  0xa4   : > { %263 = vst [vmem:[%s188_s21] sm:$0xff] %v261_v11 }
  0xa5   : > { %264 = vst [vmem:[%s188_s21 + $0x8] sm:$0xff] %v262_v12 }
  0xa6   : > { %463 = shalt.err (!%p460_p5)
}
  0xa7   : > { %379 = dma.vmem_to_hbm [thread:$0]  (%p577_p4), %s282_s23, 256, %s284_s26, %s266_s15  }
  0xa8 PF: > { %p385_p6 = scmp.ge.s32.totalorder %s514_s17, 2  ;;  %s295_s7 = sand.u32 1, %s494_s12  }
  0xa9   : > { %s296_s8 = scalar_lea.sflag [#allocation3], %s295_s7 }
  0xaa   : > { %p382_p7 = pnand %p385_p6, %p584_p8 }
  0xac   : > { %p383_p9 = pneg %p382_p7 }
  0xae   : > { %489 = dma.done.wait (%p383_p9), %s296_s8, 256  }
  0xaf   : > { %491 = vsyncadd (%p383_p9), %s296_s8, 4294967040  ;;  %s16_s17 = sadd.s32 1, %s514_s17   ;;  %s646_s12 = smov %s498_s13 }
  0xb0   : > { %p13_p10 = scmp.ge.s32.totalorder %s16_s17, 4   ;;  %s647_s13 = smov %s502_s14 }
  0xb1   : > { %s648_s14 = smov %s590_s25  ;;  %s649_s15 = smov %s510_s16 }
  0xb2   : > { %s650_s16 = smov %s652_s20  ;;  %15 = sbr.rel (!%p13_p10) target bundleno = 4 (0x4), region = 67 }
  0xb7   :  { %302 = vsyncpa [#allocation3], 1 }
  0xb8   :  { %304 = vsyncpa [#allocation3 + $0x1], 1 }

// kernel: tpu_custom_call.1
= control target key start
LH: loop header
LB: loop body
LE: loop exit
PB: predicated region body
PF: predicated region fallthrough
CT: control target
= control target key end

     0   :  { %8 = vsyncpa [#allocation3], 0  ;;  %s640_s0 = inlined_call_operand.vmem [shape: f32[2,4,256], index: 0, kind: input, shape index: {}]   ;;  %s641_s1 = inlined_call_operand.vmem [shape: f32[8,4], index: 1, kind: input, shape index: {}]   ;;  %s642_s2 = inlined_call_operand.vmem [shape: f32[8,1], index: 2, kind: input, shape index: {}]   ;;  %s643_s3 = inlined_call_operand.hbm [shape: f32[2,8,256], index: 3, kind: output, shape index: {}]  }
   0x1   :  { %10 = vsyncpa [#allocation3 + $0x1], 0  ;;  %s537_s12 = smov 0   ;;  %s539_s13 = smov 0  }
   0x2   :  { %s541_s14 = smov 0   ;;  %s543_s15 = smov 0  }
   0x3   :  { %s545_s16 = smov 0   ;;  %s547_s17 = smov 0  }
   0x4 LB: > { %s360_s18 = sadd.s32 4294967295, %s514_s17   ;;  %s361_s19 = sadd.s32 4294967294, %s514_s17   ;;  %s514_s17 = sphi %s547_s17, %s16_s17   ;;  %s510_s16 = sphi %s545_s16, %s650_s16   ;;  %s506_s15 = sphi %s543_s15, %s649_s15   ;;  %s502_s14 = sphi %s541_s14, %s648_s14   ;;  %s498_s13 = sphi %s539_s13, %s647_s13   ;;  %s494_s12 = sphi %s537_s12, %s646_s12  }
   0x5   : > { %s28_s20 = sadd.s32 1, %s510_s16  ;;  %s107_s21 = sadd.s32 1, %s502_s14 }
   0x6   : > { %p30_p0 = scmp.ge.s32.totalorder %s28_s20, 2  ;;  %p117_p1 = scmp.ne.s32.totalorder %s502_s14, %s498_s13 }
   0x7   : > { %p118_p2 = scmp.eq.s32.totalorder %s360_s18, 1  ;;  %p123_p3 = scmp.ne.s32.totalorder %s498_s13, %s494_s12 }
   0x8   : > { %s652_s20 = smov (%p30_p0, %s28_s20), 0  ;;  %p124_p5 = scmp.eq.s32.totalorder %s361_s19, 1 }
   0x9   : > { %p577_p4 = por %p118_p2, %p117_p1  ;;  %s102_s23 = ssub.s32 %s510_s16, %s652_s20 }
   0xa   : > { %p364_p6 = scmp.ge.s32.totalorder %s514_s17, 1  ;;  %p105_p7 = scmp.eq.s32.totalorder %s102_s23, 0 }
   0xb   : > { %p584_p8 = por %p124_p5, %p123_p3  ;;  %p161_p9 = scmp.lt.s32.totalorder %s514_s17, 3 }
   0xc   : > { %s590_s25 = scalar_select %p105_p7, %s502_s14, %s107_s21  }
   0xd   : > { %p162_p10 = pnand %p364_p6, %p161_p9 }
   0xe   : > { %p190_p11 = scmp.lt.s32.totalorder (!%p162_p10), %s506_s15, 1  ;;  %s186_s8 = sand.u32 (!%p162_p10), 1, %s498_s13  }
   0xf   : > { %165 = sbr.rel (%p162_p10) target bundleno = 168 (0xa8), region = 32  ;;  %s365_s9 = sshll.u32 (!%p162_p10), %s186_s8, 4 }
  0x10   : > { %s378_s10 = sshll.u32 (!%p162_p10), %s506_s15, 4  ;;  %s188_s21 = scalar_lea.vmem (!%p162_p10), [#allocation2], %s365_s9 }
  0x11   : > { %s279_s19 = scalar_lea.hbm (!%p162_p10), %s643_s3, %s378_s10  ;;  %s281_s23 = sshll.u32 (!%p162_p10), %s188_s21, 4  ;;  %s282_s23 = int_to_ptr.vmem [resolvable:$true] %s281_s23 }
  0x12   : > { %s283_s26 = sshll.u32 (!%p162_p10), %s279_s19, 4  ;;  %s456_s4 = scalar_lea.hbm (!%p162_p10), %s643_s3, 32  ;;  %s284_s26 = int_to_ptr.hbm [resolvable:$true] %s283_s26 }
  0x13   : > { %s450_s27 = sshra.s32 (!%p162_p10), %s284_s26, 4  ;;  %s451_s27 = int_to_ptr.hbm [resolvable:$true] %s450_s27 }
  0x14   : > { %v201_v0 = vld [vmem:[%s642_s2] sm:$0xff]  ;;  %v516_v1 = vmov 0   ;;  %s191_s28 = scalar_select %p190_p11, %s506_s15, 1  ;;  %vm216_vm0 = vcmask 1043456   ;;  %vm212_vm1 = vcmask 31744  }
  0x15   : > { %435 = vset.pattern.permute.xlu0 %v516_v1  ;;  %v200_v3 = vld [vmem:[%s641_s1] sm:$0xff]  ;;  %s266_s15 = scalar_lea.sflag [#allocation3], %s186_s8  ;;  %p457_p1 = scmp.lt.s32.totalorder %s451_s27, %s643_s3 }
  0x16   : > { %205 = vperm.xlu0 %435, %v201_v0   ;;  %s377_s29 = sshll.u32 %s191_s28, 3  ;;  %s452_s28 = scalar_lea.hbm %s451_s27, 16 }
  0x17   : > { %s197_s5 = scalar_lea.vmem %s640_s0, %s377_s29  ;;  %p453_p12 = scmp.ne.s32.totalorder %s451_s27, %s452_s28 }
  0x18   : > { %v202_v2 = vld [vmem:[%s197_s5] sm:$0xff]  ;;  %p458_p2 = scmp.lt.s32.totalorder %s456_s4, %s452_s28 }
  0x19   : > { %209 = vst [vmem:[#allocation1] ss:$2 sm:$0xff] %v202_v2  ;;  %p454_p13 = pnand %p453_p12, %p577_p4 }
  0x1a   : > { %p459_p3 = por %p458_p2, %p457_p1 }
  0x1b   : > { %p455_p0 = pneg %p454_p13 }
  0x1d   : > { %p460_p5 = pnand %p459_p3, %p455_p0 }
  0x20   : > { %v210_v4 = vld.sshfl [vmem:[#allocation1] sm:$0xff pattern:$0x75316420]  ;;  %v211_v5 = vld.sshfl [vmem:[#allocation1 + $0x8] sm:$0xff pattern:$0x75316420] }
  0x21   : > { %368 = vmatpush.msk.msra.mxu0 %vm216_vm0, %v210_v4  ;;  %370 = vmatpush.msk.msra.mxu1 %vm216_vm0, %v211_v5 }
  0x22   : > { %369 = vmatmul.msk.f32.vlgmr.msra.gmra.mxu0 %vm212_vm1, %v200_v3  ;;  %371 = vmatmul.msk.f32.vlgmr.msra.gmra.mxu1 %vm212_vm1, %v200_v3 }
  0x88   : > { %v206_v6 = vpop.permute.xlu0 %205 }
  0x9f   : > { %v238_v7 = vpop.f32.mrf.mxu0  ;;  %v258_v8 = vpop.f32.mrf.mxu1 }
  0xa0   : > { %v239_v9 = vadd.f32 %v238_v7, %v206_v6  ;;  %v259_v10 = vadd.f32 %v258_v8, %v206_v6 }
  0xa2   : > { %v261_v11 = vmax.f32 %v239_v9, 0.0  ;;  %v262_v12 = vmax.f32 %v259_v10, 0.0 }
  0xa4   : > { %263 = vst [vmem:[%s188_s21] sm:$0xff] %v261_v11 }
  0xa5   : > { %264 = vst [vmem:[%s188_s21 + $0x8] sm:$0xff] %v262_v12 }
  0xa6   : > { %463 = shalt.err (!%p460_p5)
}
  0xa7   : > { %379 = dma.vmem_to_hbm [thread:$0]  (%p577_p4), %s282_s23, 256, %s284_s26, %s266_s15  }
  0xa8 PF: > { %p385_p6 = scmp.ge.s32.totalorder %s514_s17, 2  ;;  %s295_s7 = sand.u32 1, %s494_s12  }
  0xa9   : > { %s296_s8 = scalar_lea.sflag [#allocation3], %s295_s7 }
  0xaa   : > { %p382_p7 = pnand %p385_p6, %p584_p8 }
  0xac   : > { %p383_p9 = pneg %p382_p7 }
  0xae   : > { %489 = dma.done.wait (%p383_p9), %s296_s8, 256  }
  0xaf   : > { %491 = vsyncadd (%p383_p9), %s296_s8, 4294967040  ;;  %s16_s17 = sadd.s32 1, %s514_s17   ;;  %s646_s12 = smov %s498_s13 }
  0xb0   : > { %p13_p10 = scmp.ge.s32.totalorder %s16_s17, 4   ;;  %s647_s13 = smov %s502_s14 }
  0xb1   : > { %s648_s14 = smov %s590_s25  ;;  %s649_s15 = smov %s510_s16 }
  0xb2   : > { %s650_s16 = smov %s652_s20  ;;  %15 = sbr.rel (!%p13_p10) target bundleno = 4 (0x4), region = 67 }
  0xb7   :  { %302 = vsyncpa [#allocation3], 1 }
  0xb8   :  { %304 = vsyncpa [#allocation3 + $0x1], 1 }

</bundles_post_ra>
